<compile_context>
chip_gen: v7x
topology: tpu7x:2x2x1
jax: 0.10.0
libtpu: 0.0.40
codegen_flags: <defaults>
</compile_context>

<pallas_src>
import jax
import jax.numpy as jnp
from jax.experimental import pallas as pl
from jax.experimental.pallas import tpu as pltpu

_LANE = 128
_SUBLANE = 8


def _round_up(x, m):
    return ((x + m - 1) // m) * m


def _make_mlp_kernel(num_hidden):
    """Kernel body: x_ref, [w_i (bf16), b_i (f32)] * num_hidden, w_f, b_f, out_ref."""

    def kernel(x_ref, *refs):
        out_ref = refs[-1]
        params = refs[:-1]

        h = x_ref[...].astype(jnp.bfloat16)              # (TB, F0) bf16 for the MXU
        idx = 0
        for _ in range(num_hidden):
            w = params[idx][...]                         # bf16 (in_pad, out_pad), BN pre-folded
            b = params[idx + 1][...]                     # f32  (1, out_pad)
            idx += 2
            z = jnp.dot(h, w, preferred_element_type=jnp.float32) + b
            h = jnp.maximum(z, 0.0).astype(jnp.bfloat16)  # ReLU in f32, keep act in bf16
            # Dropout: identity in eval mode.
        w_f = params[idx][...]                           # bf16 (in_pad, out_dim)
        b_f = params[idx + 1][...]                       # f32  (1, out_dim)
        out = jnp.dot(h, w_f, preferred_element_type=jnp.float32) + b_f
        out_ref[...] = out.astype(out_ref.dtype)

    return kernel


def _fold_bn(hidden_params, final_w, final_b):
    """Fold each hidden layer's eval-mode BN affine into the NEXT Linear.

    relu(z)*s + sh followed by @W + b  ==  relu(z) @ (s[:,None]*W) + (sh@W + b),
    which is unconditionally correct (fold-into-next, not into-same layer).
    """
    raw_ws = [p[0] for p in hidden_params] + [final_w]
    raw_bs = [p[1] for p in hidden_params] + [final_b]
    folded_ws = [raw_ws[0]]
    folded_bs = [raw_bs[0]]
    for i, (_, _, scale, shift) in enumerate(hidden_params):
        s = scale.reshape(-1)            # (F,)
        sh = shift.reshape(1, -1)        # (1, F)
        w_next = raw_ws[i + 1]
        b_next = raw_bs[i + 1]
        folded_ws.append(s[:, None] * w_next)
        folded_bs.append(sh @ w_next + b_next)
    return folded_ws, folded_bs


def _pad_hidden_widths(ws, bs):
    """Zero-pad every *intermediate* feature width to a multiple of 128 lanes.

    Input width (F0) and output width (out_dim) are left unpadded so HBM
    traffic for x / out is not inflated.  Exact: padded output lanes have zero
    weight columns and zero bias (-> activation exactly 0), and the next
    weight's padded input rows are zero.
    """
    widths = [ws[0].shape[0]] + [w.shape[1] for w in ws]           # [F0, F1, ..., Fout]
    pads = [widths[0]] + [_round_up(f, _LANE) for f in widths[1:-1]] + [widths[-1]]
    pw, pb = [], []
    for i, (w, b) in enumerate(zip(ws, bs)):
        rp = pads[i] - w.shape[0]
        cp = pads[i + 1] - w.shape[1]
        pw.append(jnp.pad(w, ((0, rp), (0, cp))))
        pb.append(jnp.pad(b, ((0, 0), (0, cp))))
    return pw, pb


def _choose_tb(B):
    """Pick a batch tile: big tiles for large B (amortize ~0.35us/step), small
    tail waste, and >= 2 grid steps when B >= 16 so v7x's 2nd TC has work."""
    B8 = _round_up(max(B, 1), _SUBLANE)
    if B8 <= _SUBLANE:
        return B8
    best_tb, best_cost = None, None
    for tb in (2048, 1024, 512, 256, 128, 64, 32, 16, 8):
        if tb > B8:
            continue
        n = pl.cdiv(B8, tb)
        if B8 >= 16 and n < 2:
            continue                      # keep >= 2 steps (v7x megacore sharding)
        pad_rows = n * tb - B
        cost = n * 1024 + pad_rows        # per-step overhead ~ "1024 rows" of work
        if best_cost is None or cost < best_cost:
            best_tb, best_cost = tb, cost
    return best_tb if best_tb is not None else B8


def text_decoder_forward(x, hidden_params, final_w, final_b):
    """Fused textDecoder forward (eval mode) as a single Pallas kernel.

    x:             (B, F0) float32
    hidden_params: list of (w (Fi, Fi+1), b (1, Fi+1), bn_scale (1, Fi+1), bn_shift (1, Fi+1))
    final_w:       (F_last, output_size)
    final_b:       (1, output_size)
    """
    B, F0 = x.shape
    out_dim = final_w.shape[1]

    # 1) Fold BN eval affines into adjacent Linear layers (pure JAX, trace time).
    folded_ws, folded_bs = _fold_bn(hidden_params, final_w, final_b)
    num_hidden = len(folded_ws) - 1

    # 2) Pad all intermediate widths to 128 lanes (exact; see helper docstring).
    pw, pb = _pad_hidden_widths(folded_ws, folded_bs)

    # 3) bf16 weights for the MXU, f32 biases for the VPU epilogue.
    flat_params = []
    for w, b in zip(pw, pb):
        flat_params += [w.astype(jnp.bfloat16), b.astype(jnp.float32)]
    # NOTE: after the 128-pad these are already lane-aligned, one-shot DMAs
    # (constant block index); packing them into a single (L,128,128) slab is a
    # further small startup-DMA win but is skipped for shape generality.

    # 4) Batch tiling.
    TB = _choose_tb(B)
    B_pad = _round_up(B, TB)
    x_p = jnp.pad(x, ((0, B_pad - B), (0, 0))) if B_pad != B else x
    grid = (B_pad // TB,)

    in_specs = [pl.BlockSpec((TB, F0), lambda i: (i, 0))]
    for p in flat_params:
        # default-arg binding avoids the late-binding closure bug
        in_specs.append(pl.BlockSpec(p.shape, lambda i, nd=p.ndim: (0,) * nd))
    # Output stored at its true width (out_dim): ~12.8x less HBM writeback than
    # a 128-lane padded f32 output for out_dim=10.
    out_specs = pl.BlockSpec((TB, out_dim), lambda i: (i, 0))

    # 5) VMEM budget from actual live buffers (no 32 MiB floor; v7x-friendly).
    param_bytes = sum(int(p.size) * p.dtype.itemsize for p in flat_params)
    max_w = max([F0] + [w.shape[1] for w in pw])
    io_bytes = 2 * TB * (F0 + out_dim) * 4          # double-buffered x / out tiles (f32)
    act_bytes = 2 * TB * max_w * 6                  # f32 accumulator + bf16 act, 2x slack
    vmem_limit = int(min(2 * param_bytes + io_bytes + act_bytes + (4 << 20), 48 << 20))

    kernel = _make_mlp_kernel(num_hidden)

    out = pl.pallas_call(
        kernel,
        out_shape=jax.ShapeDtypeStruct((B_pad, out_dim), jnp.float32),
        grid=grid,
        in_specs=in_specs,
        out_specs=out_specs,
        compiler_params=pltpu.CompilerParams(
            dimension_semantics=("parallel",),
            vmem_limit_bytes=vmem_limit),
    )(x_p, *flat_params)

    return out[:B] if B_pad != B else out


def build_params(key, layers, output_size, bn_eps=1e-5):
    """Parameter construction mirroring textDecoder.__init__ (with non-trivial
    BN running stats so the eval-mode BN fold is actually exercised)."""
    layers = layers[::-1]  # the module reverses the list
    hidden_params = []
    keys = jax.random.split(key, 5 * max(len(layers), 1))
    for i, size in enumerate(layers[:-1]):
        fan_in, fan_out = size, layers[i + 1]
        std = (2.0 / (fan_in + fan_out)) ** 0.5            # xavier_normal_
        kw, kg, kb, km, kv = keys[5 * i:5 * i + 5]
        # PyTorch Linear weight is (out, in); store transposed (in, out).
        w = jax.random.normal(kw, (fan_in, fan_out), jnp.float32) * std
        b = jnp.zeros((1, fan_out), jnp.float32)           # bias.data.fill_(0)
        gamma = 1.0 + 0.1 * jax.random.normal(kg, (1, fan_out), jnp.float32)
        beta = 0.1 * jax.random.normal(kb, (1, fan_out), jnp.float32)
        run_mean = 0.1 * jax.random.normal(km, (1, fan_out), jnp.float32)
        run_var = jnp.abs(1.0 + 0.1 * jax.random.normal(kv, (1, fan_out), jnp.float32))
        scale = gamma / jnp.sqrt(run_var + bn_eps)          # BN eval affine
        shift = beta - run_mean * scale
        hidden_params.append((w, b, scale, shift))
    fan_in, fan_out = layers[-1], output_size
    std = (2.0 / (fan_in + fan_out)) ** 0.5
    final_w = jax.random.normal(keys[-1], (fan_in, fan_out), jnp.float32) * std
    final_b = jnp.zeros((1, fan_out), jnp.float32)
    return hidden_params, final_w, final_b


def reference_forward_f32(x, hidden_params, final_w, final_b):
    """Pure-f32 eval-mode reference (exact module semantics)."""
    h = x
    for (w, b, s, sh) in hidden_params:
        h = jnp.maximum(h @ w + b, 0.0) * s + sh
    return h @ final_w + final_b


def reference_forward_bf16(x, hidden_params, final_w, final_b):
    """Pure-JAX reference matching the kernel's bf16-operand / f32-accumulate path."""
    ws, bs = _fold_bn(hidden_params, final_w, final_b)
    h = x.astype(jnp.bfloat16)
    for w, b in zip(ws[:-1], bs[:-1]):
        z = jnp.dot(h, w.astype(jnp.bfloat16),
                    preferred_element_type=jnp.float32) + b
        h = jnp.maximum(z, 0.0).astype(jnp.bfloat16)
    return jnp.dot(h, ws[-1].astype(jnp.bfloat16),
                   preferred_element_type=jnp.float32) + bs[-1]


if __name__ == "__main__":
    key = jax.random.PRNGKey(0)
    k_params, k_x = jax.random.split(key)

    # textDecoder(output_size=10, layers=[16, 32, 64]) -> reversed [64, 32, 16]
    layers = [16, 32, 64]
    output_size = 10
    batch = 24   # small, but exercises a 2-step grid + batch-tail padding

    hidden_params, final_w, final_b = build_params(k_params, layers, output_size)
    x = jax.random.normal(k_x, (batch, layers[-1]), jnp.float32)  # (24, 64)

    out = text_decoder_forward(x, hidden_params, final_w, final_b)
    out = jax.block_until_ready(out)
    assert out.shape == (batch, output_size), out.shape

    # Check against the bf16-matched reference (same arithmetic path).
    ref_bf16 = reference_forward_bf16(x, hidden_params, final_w, final_b)
    assert jnp.allclose(out, ref_bf16, atol=2e-3, rtol=2e-3), (
        float(jnp.max(jnp.abs(out - ref_bf16))))

    # Sanity check against the exact f32 module semantics (bf16 rounding tolerance).
    ref_f32 = reference_forward_f32(x, hidden_params, final_w, final_b)
    assert jnp.allclose(out, ref_f32, atol=1e-1, rtol=1e-1), (
        float(jnp.max(jnp.abs(out - ref_f32))))

    print("KERNEL_OK")
</pallas_src>

<mosaic_0001>
module attributes {stable_mosaic.version = 11 : i64} {
  func.func @kernel(%arg0: i32, %arg1: memref<16x64xf32, #tpu.memory_space<vmem>>, %arg2: memref<64x128xbf16, #tpu.memory_space<vmem>>, %arg3: memref<1x128xf32, #tpu.memory_space<vmem>>, %arg4: memref<128x128xbf16, #tpu.memory_space<vmem>>, %arg5: memref<1x128xf32, #tpu.memory_space<vmem>>, %arg6: memref<128x10xbf16, #tpu.memory_space<vmem>>, %arg7: memref<1x10xf32, #tpu.memory_space<vmem>>, %arg8: memref<16x10xf32, #tpu.memory_space<vmem>>) attributes {dimension_semantics = [#tpu.dimension_semantics<parallel>], iteration_bounds = array<i64: 2>, scalar_prefetch = 0 : i64, scratch_operands = 0 : i64, tpu.core_type = #tpu.core_type<tc>, window_params = [{transform_indices = @transform_0, window_bounds = array<i64: 16, 64>}, {pipeline_mode = #tpu.pipeline_mode<synchronous>, transform_indices = @transform_1, window_bounds = array<i64: 64, 128>}, {pipeline_mode = #tpu.pipeline_mode<synchronous>, transform_indices = @transform_2, window_bounds = array<i64: 1, 128>}, {pipeline_mode = #tpu.pipeline_mode<synchronous>, transform_indices = @transform_3, window_bounds = array<i64: 128, 128>}, {pipeline_mode = #tpu.pipeline_mode<synchronous>, transform_indices = @transform_4, window_bounds = array<i64: 1, 128>}, {pipeline_mode = #tpu.pipeline_mode<synchronous>, transform_indices = @transform_5, window_bounds = array<i64: 128, 10>}, {pipeline_mode = #tpu.pipeline_mode<synchronous>, transform_indices = @transform_6, window_bounds = array<i64: 1, 10>}, {transform_indices = @transform_7, window_bounds = array<i64: 16, 10>}]} {
    %c0 = arith.constant 0 : index
    %c0_0 = arith.constant 0 : index
    %0 = vector.load %arg1[%c0, %c0_0] : memref<16x64xf32, #tpu.memory_space<vmem>>, vector<16x64xf32>
    %1 = arith.truncf %0 : vector<16x64xf32> to vector<16x64xbf16>
    %c0_1 = arith.constant 0 : index
    %c0_2 = arith.constant 0 : index
    %2 = vector.load %arg2[%c0_1, %c0_2] : memref<64x128xbf16, #tpu.memory_space<vmem>>, vector<64x128xbf16>
    %c0_3 = arith.constant 0 : index
    %c0_4 = arith.constant 0 : index
    %3 = vector.load %arg3[%c0_3, %c0_4] : memref<1x128xf32, #tpu.memory_space<vmem>>, vector<1x128xf32>
    %cst = arith.constant dense<0.000000e+00> : vector<16x128xf32>
    %4 = tpu.matmul %1, %2, %cst {dimension_numbers = #tpu.dot_dimension_numbers<[1], [0], [0], [1], [0, 0, 1, 1], [], []>} : vector<16x64xbf16>, vector<64x128xbf16>, vector<16x128xf32> -> vector<16x128xf32>
    %5 = vector.broadcast %3 : vector<1x128xf32> to vector<16x128xf32>
    %6 = arith.addf %4, %5 : vector<16x128xf32>
    %cst_5 = arith.constant 0.000000e+00 : f32
    %7 = vector.broadcast %cst_5 : f32 to vector<16x128xf32>
    %8 = arith.maximumf %6, %7 : vector<16x128xf32>
    %9 = arith.truncf %8 : vector<16x128xf32> to vector<16x128xbf16>
    %c0_6 = arith.constant 0 : index
    %c0_7 = arith.constant 0 : index
    %10 = vector.load %arg4[%c0_6, %c0_7] : memref<128x128xbf16, #tpu.memory_space<vmem>>, vector<128x128xbf16>
    %c0_8 = arith.constant 0 : index
    %c0_9 = arith.constant 0 : index
    %11 = vector.load %arg5[%c0_8, %c0_9] : memref<1x128xf32, #tpu.memory_space<vmem>>, vector<1x128xf32>
    %cst_10 = arith.constant dense<0.000000e+00> : vector<16x128xf32>
    %12 = tpu.matmul %9, %10, %cst_10 {dimension_numbers = #tpu.dot_dimension_numbers<[1], [0], [0], [1], [0, 0, 1, 1], [], []>} : vector<16x128xbf16>, vector<128x128xbf16>, vector<16x128xf32> -> vector<16x128xf32>
    %13 = vector.broadcast %11 : vector<1x128xf32> to vector<16x128xf32>
    %14 = arith.addf %12, %13 : vector<16x128xf32>
    %cst_11 = arith.constant 0.000000e+00 : f32
    %15 = vector.broadcast %cst_11 : f32 to vector<16x128xf32>
    %16 = arith.maximumf %14, %15 : vector<16x128xf32>
    %17 = arith.truncf %16 : vector<16x128xf32> to vector<16x128xbf16>
    %c0_12 = arith.constant 0 : index
    %c0_13 = arith.constant 0 : index
    %18 = vector.load %arg6[%c0_12, %c0_13] : memref<128x10xbf16, #tpu.memory_space<vmem>>, vector<128x10xbf16>
    %c0_14 = arith.constant 0 : index
    %c0_15 = arith.constant 0 : index
    %19 = vector.load %arg7[%c0_14, %c0_15] : memref<1x10xf32, #tpu.memory_space<vmem>>, vector<1x10xf32>
    %cst_16 = arith.constant dense<0.000000e+00> : vector<16x10xf32>
    %20 = tpu.matmul %17, %18, %cst_16 {dimension_numbers = #tpu.dot_dimension_numbers<[1], [0], [0], [1], [0, 0, 1, 1], [], []>} : vector<16x128xbf16>, vector<128x10xbf16>, vector<16x10xf32> -> vector<16x10xf32>
    %21 = vector.broadcast %19 : vector<1x10xf32> to vector<16x10xf32>
    %22 = arith.addf %20, %21 : vector<16x10xf32>
    %c0_17 = arith.constant 0 : index
    %c0_18 = arith.constant 0 : index
    %23 = vector.load %arg8[%c0_17, %c0_18] : memref<16x10xf32, #tpu.memory_space<vmem>>, vector<16x10xf32>
    tpu.vector_store %arg8[%c0_17, %c0_18], %22 {strides = array<i32>} : memref<16x10xf32, #tpu.memory_space<vmem>>, vector<16x10xf32>,
    return
  }
  func.func @transform_0(%arg0: i32) -> (i32, i32) {
    %c0_i32 = arith.constant 0 : i32
    %c0_i32_0 = arith.constant 0 : i32
    return %arg0, %c0_i32 : i32, i32
  }
  func.func @transform_1(%arg0: i32) -> (i32, i32) {
    %c0_i32 = arith.constant 0 : i32
    %c0_i32_0 = arith.constant 0 : i32
    %c0_i32_1 = arith.constant 0 : i32
    return %c0_i32, %c0_i32_0 : i32, i32
  }
  func.func @transform_2(%arg0: i32) -> (i32, i32) {
    %c0_i32 = arith.constant 0 : i32
    %c0_i32_0 = arith.constant 0 : i32
    %c0_i32_1 = arith.constant 0 : i32
    return %c0_i32, %c0_i32_0 : i32, i32
  }
  func.func @transform_3(%arg0: i32) -> (i32, i32) {
    %c0_i32 = arith.constant 0 : i32
    %c0_i32_0 = arith.constant 0 : i32
    %c0_i32_1 = arith.constant 0 : i32
    return %c0_i32, %c0_i32_0 : i32, i32
  }
  func.func @transform_4(%arg0: i32) -> (i32, i32) {
    %c0_i32 = arith.constant 0 : i32
    %c0_i32_0 = arith.constant 0 : i32
    %c0_i32_1 = arith.constant 0 : i32
    return %c0_i32, %c0_i32_0 : i32, i32
  }
  func.func @transform_5(%arg0: i32) -> (i32, i32) {
    %c0_i32 = arith.constant 0 : i32
    %c0_i32_0 = arith.constant 0 : i32
    %c0_i32_1 = arith.constant 0 : i32
    return %c0_i32, %c0_i32_0 : i32, i32
  }
  func.func @transform_6(%arg0: i32) -> (i32, i32) {
    %c0_i32 = arith.constant 0 : i32
    %c0_i32_0 = arith.constant 0 : i32
    %c0_i32_1 = arith.constant 0 : i32
    return %c0_i32, %c0_i32_0 : i32, i32
  }
  func.func @transform_7(%arg0: i32) -> (i32, i32) {
    %c0_i32 = arith.constant 0 : i32
    %c0_i32_0 = arith.constant 0 : i32
    return %arg0, %c0_i32 : i32, i32
  }
}

</mosaic_0001>

<bundles_post_ra>
// kernel: tpu_custom_call.1
= control target key start
LH: loop header
LB: loop body
LE: loop exit
PB: predicated region body
PF: predicated region fallthrough
CT: control target
= control target key end

     0   :  { %12 = vsyncpa [#allocation3], 0  ;;  %s1279_s0 = inlined_call_operand.hbm [shape: f32[32,64], index: 0, kind: input, shape index: {}]   ;;  %s1280_s1 = inlined_call_operand.hbm [shape: bf16[64,128], index: 1, kind: input, shape index: {}]   ;;  %s1281_s2 = inlined_call_operand.vmem [shape: f32[1,128], index: 2, kind: input, shape index: {}]   ;;  %s1282_s3 = inlined_call_operand.vmem [shape: bf16[128,128], index: 3, kind: input, shape index: {}]   ;;  %s1283_s4 = inlined_call_operand.vmem [shape: f32[1,128], index: 4, kind: input, shape index: {}]   ;;  %s1284_s5 = inlined_call_operand.vmem [shape: bf16[128,10], index: 5, kind: input, shape index: {}]   ;;  %s1285_s6 = inlined_call_operand.vmem [shape: f32[1,10], index: 6, kind: input, shape index: {}]   ;;  %s1286_s7 = inlined_call_operand.vmem [shape: f32[32,10], index: 7, kind: output, shape index: {}]  }
   0x1   :  { %14 = vsyncpa [#allocation3 + $0x1], 0 }
   0x2   :  { %15 = vsyncpa [#allocation5], 0  ;;  %s1051_s24 = smov 0   ;;  %s1053_s25 = smov 0  }
   0x3   :  { %s1055_s26 = smov 0   ;;  %s1057_s27 = smov 0  }
   0x4 LB: > { %s714_s28 = sadd.s32 4294967295, %s1001_s27   ;;  %p41_p0 = scmp.ne.s32.totalorder %s993_s25, %s989_s24  ;;  %s1001_s27 = sphi %s1057_s27, %s1302_s27   ;;  %s997_s26 = sphi %s1055_s26, %s1301_s26   ;;  %s993_s25 = sphi %s1053_s25, %s1300_s25   ;;  %s989_s24 = sphi %s1051_s24, %s1299_s24  }
   0x5   : > { %p1073_p1 = scmp.eq.s32.totalorder %s714_s28, 0  ;;  %p716_p2 = scmp.ge.s32.totalorder %s1001_s27, 1 }
   0x6   : > { %p204_p3 = scmp.lt.s32.totalorder %s1001_s27, 3  ;;  %s1003_s9 = smov [#allocation4]  }
   0x7   : > { %s1291_s29 = scalar_select %p1073_p1, 1, 0 }
   0x8   : > { %p1081_p4 = por %p1073_p1, %p41_p0  ;;  %p1085_p5 = pnand %p716_p2, %p204_p3 }
   0x9   : > { %s216_s10 = sshll.u32 %s1003_s9, 4  ;;  %s1098_s12 = sadd.s32 1, %s1001_s27   ;;  %s217_s10 = int_to_ptr.vmem [resolvable:$true] %s216_s10 }
   0xa   : > { %s1292_s30 = scalar_select %p1081_p4, 1, 0 }
   0xb   : > { %s1293_s8 = scalar_select %p1085_p5, 1, 0 }
   0xc   : > { %p835_p6 = pneg %p1085_p5  ;;  %s28_s13 = sadd.s32 1, %s997_s26 }
   0xd   : > { %s25_s14 = ssub.s32 %s1001_s27, %s1098_s12  ;;  %s905_s17 = scalar_lea.hbm %s1280_s1, 512 }
   0xe   : > { %p1093_p7 = pnand %p835_p6, %p1073_p1  ;;  %p906_p8 = scmp.ne.s32.totalorder %s1280_s1, %s905_s17 }
   0xf   : > { %p912_p12 = scmp.lt.u32.totalorder %s905_s17, %s1280_s1 }
  0x10   : > { %p907_p9 = pneg %p1093_p7 }
  0x12   : > { %p908_p10 = pnand %p907_p9, %p906_p8 }
  0x14   : > { %p909_p11 = pneg %p908_p10 }
  0x16   : > { %p914_p13 = pnand %p912_p12, %p909_p11 }
  0x18   : > { %917 = shalt.err (!%p914_p13)
}
  0x19   : > { %s918_s22 = scalar_lea.vmem %s217_s10, 512  ;;  %p926_p6 = scmp.lt.s32.totalorder %s217_s10, %s217_s10 }
  0x1a   : > { %p919_p0 = scmp.ne.s32.totalorder %s217_s10, %s918_s22  ;;  %p927_p1 = scmp.lt.s32.totalorder %s918_s22, %s918_s22 }
  0x1c   : > { %p921_p2 = pnand %p919_p0, %p907_p9  ;;  %p928_p4 = por %p927_p1, %p926_p6 }
  0x1e   : > { %p922_p3 = pneg %p921_p2 }
  0x20   : > { %p929_p5 = pnand %p928_p4, %p922_p3 }
  0x22   : > { %932 = shalt.err (!%p929_p5)
}
  0x23   : > { %s1004_s23 = smov 64   ;;  %s1005_s24 = smov 4  }
  0x24   : > { %838 = dma.hbm_to_vmem [thread:$0]  (!%p1093_p7), %s1280_s1, 512, %s217_s10, [#allocation5], %s1004_s23, %s1004_s23, %s1005_s24  }
  0x25   : > { %p26_p8 = scmp.eq.s32.totalorder %s25_s14, 0  ;;  %p35_p9 = scmp.ne.s32.totalorder %s997_s26, %s993_s25 }
  0x26   : > { %p36_p1 = scmp.eq.s32.totalorder %s1001_s27, 0  ;;  %p844_p4 = scmp.lt.s32.totalorder %s1001_s27, 2 }
  0x27   : > { %s1124_s16 = scalar_select %p26_p8, %s997_s26, %s28_s13  }
  0x28   : > { %p37_p5 = por %p36_p1, %p35_p9  ;;  %s245_s17 = sand.u32 1, %s997_s26  }
  0x29   : > { %s719_s18 = sshll.u32 %s245_s17, 4  ;;  %s753_s19 = sshll.u32 %s1001_s27, 8 }
  0x2a   : > { %s1131_s22 = scalar_lea.hbm %s1279_s0, %s753_s19  ;;  %s249_s10 = scalar_lea.vmem [#allocation2], %s719_s18 }
  0x2b   : > { %s256_s11 = sshll.u32 %s249_s10, 4  ;;  %p1135_p7 = pnand %p844_p4, %p37_p5  ;;  %s1133_s11 = int_to_ptr.vmem [resolvable:$true] %s256_s11 }
  0x2c   : > { %s1139_s14 = scalar_lea.sflag [#allocation3], %s245_s17  ;;  %s933_s23 = scalar_lea.hbm %s1131_s22, 256 }
  0x2d   : > { %p934_p10 = scmp.ne.s32.totalorder %s1131_s22, %s933_s23  ;;  %p935_p11 = pneg %p1135_p7 }
  0x2e   : > { %s938_s15 = scalar_lea.hbm %s1279_s0, 512  ;;  %p939_p0 = scmp.lt.u32.totalorder %s1131_s22, %s1279_s0 }
  0x2f   : > { %p936_p12 = pnand %p935_p11, %p934_p10  ;;  %p940_p2 = scmp.lt.u32.totalorder %s938_s15, %s933_s23 }
  0x30   : > { %p942_p6 = scmp.lt.u32.totalorder %s933_s23, %s1131_s22 }
  0x31   : > { %p937_p13 = pneg %p936_p12  ;;  %p941_p3 = por %p940_p2, %p939_p0 }
  0x33   : > { %p943_p8 = por %p942_p6, %p941_p3 }
  0x35   : > { %p944_p9 = pnand %p943_p8, %p937_p13 }
  0x37   : > { %947 = shalt.err (!%p944_p9)
}
  0x38   : > { %s948_s17 = scalar_lea.vmem %s1133_s11, 256  ;;  %s1006_s20 = smov [#allocation2]  }
  0x39   : > { %p949_p1 = scmp.ne.s32.totalorder %s1133_s11, %s948_s17  ;;  %s953_s21 = sshll.u32 %s1006_s20, 4  ;;  %s954_s21 = int_to_ptr.vmem [resolvable:$false] %s953_s21 }
  0x3a   : > { %s955_s10 = scalar_lea.vmem %s954_s21, 512  ;;  %p956_p10 = scmp.lt.s32.totalorder %s1133_s11, %s954_s21 }
  0x3b   : > { %p951_p4 = pnand %p949_p1, %p935_p11  ;;  %p957_p12 = scmp.lt.s32.totalorder %s955_s10, %s948_s17 }
  0x3d   : > { %p952_p5 = pneg %p951_p4  ;;  %p958_p0 = por %p957_p12, %p956_p10 }
  0x3f   : > { %p959_p2 = pnand %p958_p0, %p952_p5 }
  0x41   : > { %962 = shalt.err (!%p959_p2)
}
  0x42   : > { %s1007_s23 = smov 128   ;;  %s1008_s24 = smov 8  }
  0x43   : > { %842 = dma.hbm_to_vmem [thread:$0]  (!%p1135_p7), %s1131_s22, 256, %s1133_s11, %s1139_s14, %s1007_s23, %s1007_s23, %s1008_s24  }
  0x44   : > { %p1296_p11 = scmp.ne.s32.totalorder %s1293_s8, 0 }
  0x45   : > { %s270_s9 = sand.u32 (!%p1296_p11), 1, %s993_s25   ;;  %p1297_p13 = scmp.ne.s32.totalorder (!%p1296_p11), %s1292_s30, 0 }
  0x46   : > { %268 = sbr.rel (%p1296_p11) target bundleno = 756 (0x2f4), region = 48  ;;  %s723_s15 = sshll.u32 (!%p1296_p11), %s270_s9, 4 }
  0x47   : > { %s271_s18 = scalar_lea.sflag (!%p1296_p11), [#allocation3], %s270_s9  ;;  %s274_s19 = scalar_lea.vmem (!%p1296_p11), [#allocation2], %s723_s15 }
  0x4d   : > { %980 = dma.done.wait (%p1297_p13), %s271_s18, 256  }
  0x4e   : > { %982 = vsyncadd (%p1297_p13), %s271_s18, 4294967040  ;;  %p1298_p3 = scmp.ne.s32.totalorder %s1291_s29, 0 }
  0x50   : > { %984 = dma.done.wait (%p1298_p3), [#allocation5], 512  }
  0x51   : > { %986 = vsyncadd (%p1298_p3), [#allocation5], 4294966784  ;;  %v1009_v0 = vmov 0.0   ;;  %vm1010_vm0 = vmmov 0   ;;  %v885_v1 = vld [vmem:[#allocation4] sm:$0xff]   ;;  %v886_v2 = vld [vmem:[#allocation4 + $0x8] sm:$0xff]  }
  0x52   : > { %777 = vmatprep.subr.bf16.mxu0 %v1009_v0  ;;  %785 = vmatprep.mubr.msk.bf16.mxu0 %vm1010_vm0, %v1009_v0  ;;  %v889_v3 = vld [vmem:[%s1282_s3] sm:$0xff]   ;;  %v887_v4 = vld [vmem:[#allocation4 + $0x10] sm:$0xff]   ;;  %v890_v5 = vld [vmem:[%s1282_s3 + $0x8] sm:$0xff]   ;;  %vm359_vm1 = vcmask 523264   ;;  %s725_s8 = sshll.u32 %s714_s28, 1  ;;  %vm634_vm2 = vcmask 80896  }
  0x53   : > { %789 = vmatprep.subr.bf16.mxu1 %v1009_v0  ;;  %805 = vmatprep.mubr.msk.bf16.mxu1 %vm1010_vm0, %v1009_v0  ;;  %v888_v6 = vld [vmem:[#allocation4 + $0x18] sm:$0xff]   ;;  %v317_v7 = vld [vmem:[%s274_s19] sm:$0xff]  ;;  %v894_v13 = vld [vmem:[%s1282_s3 + $0x28] sm:$0xff]   ;;  %p311_p7 = scmp.lt.s32.totalorder %s725_s8, 3 }
  0x54   : > { %778 = vmatpush3.bf16.msra.mxu0 %v885_v1  ;;  %790 = vmatpush3.bf16.msra.mxu1 %v889_v3  ;;  %v318_v8 = vld [vmem:[%s274_s19 + $0x8] sm:$0xff]  ;;  %v891_v9 = vld [vmem:[%s1282_s3 + $0x10] sm:$0xff]   ;;  %v893_v12 = vld [vmem:[%s1282_s3 + $0x20] sm:$0xff]  }
  0x55   : > { %779 = vmatprep.subr.bf16.mxu0 %v1009_v0  ;;  %791 = vmatprep.subr.bf16.mxu1 %v1009_v0  ;;  %v319_v10 = vpack.c.bf16 %v318_v8, %v317_v7  ;;  %v892_v11 = vld [vmem:[%s1282_s3 + $0x18] sm:$0xff]   ;;  %v895_v14 = vld [vmem:[%s1282_s3 + $0x30] sm:$0xff]   ;;  %v897_v16 = vld [vmem:[%s1284_s5] sm:$0xff]   ;;  %s1304_s8 = smov (!%p311_p7, %s725_s8), 3 }
  0x56   : > { %v896_v15 = vld [vmem:[%s1282_s3 + $0x38] sm:$0xff]   ;;  %v898_v17 = vld [vmem:[%s1284_s5 + $0x8] sm:$0xff]   ;;  %v899_v18 = vld [vmem:[%s1284_s5 + $0x10] sm:$0xff]   ;;  %s726_s22 = sshll.u32 %s1304_s8, 3 }
  0x57   : > { %v900_v19 = vld [vmem:[%s1284_s5 + $0x18] sm:$0xff]   ;;  %v901_v20 = vld [vmem:[%s1284_s5 + $0x20] sm:$0xff]   ;;  %v902_v21 = vld [vmem:[%s1284_s5 + $0x28] sm:$0xff]   ;;  %s314_s20 = scalar_lea.vmem %s1286_s7, %s726_s22 }
  0x58   : > { %780 = vmatpush3.bf16.msra.mxu0 %v886_v2  ;;  %792 = vmatpush3.bf16.msra.mxu1 %v890_v5  ;;  %v727_v22 = vld [vmem:[%s1281_s2] ss:$0 sm:$0xff]  ;;  %v903_v32 = vld [vmem:[%s1284_s5 + $0x30] sm:$0xff]   ;;  %v904_v33 = vld [vmem:[%s1284_s5 + $0x38] sm:$0xff]  }
  0x59   : > { %781 = vmatprep.subr.bf16.mxu0 %v1009_v0  ;;  %793 = vmatprep.subr.bf16.mxu1 %v1009_v0  ;;  %v733_v34 = vld [vmem:[%s1283_s4] ss:$0 sm:$0xff] }
  0x5a   : > { %v742_v44 = vld [vmem:[%s1285_s6] ss:$0 sm:$0xff] }
  0x5c   : > { %782 = vmatpush3.bf16.msra.mxu0 %v887_v4  ;;  %794 = vmatpush3.bf16.msra.mxu1 %v891_v9 }
  0x5d   : > { %783 = vmatprep.subr.bf16.mxu0 %v1009_v0  ;;  %795 = vmatprep.subr.bf16.mxu1 %v1009_v0 }
  0x60   : > { %784 = vmatpush3.bf16.msra.mxu0 %v888_v6  ;;  %796 = vmatpush3.bf16.msra.mxu1 %v892_v11 }
  0x61   : > { %809 = vmatprep.subr.bf16.mxu0 %v1009_v0  ;;  %797 = vmatprep.subr.bf16.mxu1 %v1009_v0 }
  0x63   : > { %786 = vmatmul.mubr.msk.bf16.vlgmr.msra.gmra.mrb[0].mxu0 %vm359_vm1, %v319_v10 }
  0x64   : > { %825 = vmatprep.mubr.msk.bf16.mxu0 %vm1010_vm0, %v1009_v0  ;;  %798 = vmatpush3.bf16.msra.mxu1 %v893_v12 }
  0x65   : > { %799 = vmatprep.subr.bf16.mxu1 %v1009_v0  ;;  %810 = vmatpush3.bf16.msra.mxu0 %v897_v16 }
  0x66   : > { %811 = vmatprep.subr.bf16.mxu0 %v1009_v0 }
  0x68   : > { %800 = vmatpush3.bf16.msra.mxu1 %v894_v13 }
  0x69   : > { %801 = vmatprep.subr.bf16.mxu1 %v1009_v0  ;;  %812 = vmatpush3.bf16.msra.mxu0 %v898_v17 }
  0x6a   : > { %813 = vmatprep.subr.bf16.mxu0 %v1009_v0 }
  0x6c   : > { %802 = vmatpush3.bf16.msra.mxu1 %v895_v14 }
  0x6d   : > { %803 = vmatprep.subr.bf16.mxu1 %v1009_v0  ;;  %814 = vmatpush3.bf16.msra.mxu0 %v899_v18 }
  0x6e   : > { %815 = vmatprep.subr.bf16.mxu0 %v1009_v0 }
  0x70   : > { %804 = vmatpush3.bf16.msra.mxu1 %v896_v15 }
  0x71   : > { %816 = vmatpush3.bf16.msra.mxu0 %v900_v19 }
  0x72   : > { %817 = vmatprep.subr.bf16.mxu0 %v1009_v0 }
  0x75   : > { %818 = vmatpush3.bf16.msra.mxu0 %v901_v20 }
  0x76   : > { %819 = vmatprep.subr.bf16.mxu0 %v1009_v0 }
  0x79   : > { %820 = vmatpush3.bf16.msra.mxu0 %v902_v21 }
  0x7a   : > { %821 = vmatprep.subr.bf16.mxu0 %v1009_v0 }
  0x7d   : > { %822 = vmatpush3.bf16.msra.mxu0 %v903_v32 }
  0x7e   : > { %823 = vmatprep.subr.bf16.mxu0 %v1009_v0 }
  0x81   : > { %824 = vmatpush3.bf16.msra.mxu0 %v904_v33 }
 0x136   : > { %v397_v23 = vpop.f32.mrb[0].mxu0 }
 0x137   : > { %v398_v24 = vadd.f32 %v727_v22, %v397_v23  ;;  %v787_v25 = vpop.f32.mrb[1].mxu0 }
 0x138   : > { %v400_v26 = vpop.f32.mrb[2].mxu0 }
 0x139   : > { %v401_v27 = vadd.f32 %v727_v22, %v400_v26  ;;  %v788_v28 = vpop.f32.mrb[3].mxu0  ;;  %v404_v29 = vmax.f32 %v398_v24, 0.0 }
 0x13b   : > { %v405_v30 = vmax.f32 %v401_v27, 0.0 }
 0x13d   : > { %v406_v31 = vpack.c.bf16 %v405_v30, %v404_v29 }
 0x13f   : > { %806 = vmatmul.mubr.bf16.vlgmr.msra.gmra.mrb[0].mxu1 %v406_v31 }
 0x212   : > { %v512_v35 = vpop.f32.mrb[0].mxu1 }
 0x213   : > { %v513_v36 = vadd.f32 %v733_v34, %v512_v35  ;;  %v807_v37 = vpop.f32.mrb[1].mxu1 }
 0x214   : > { %v515_v38 = vpop.f32.mrb[2].mxu1 }
 0x215   : > { %v516_v39 = vadd.f32 %v733_v34, %v515_v38  ;;  %v808_v40 = vpop.f32.mrb[3].mxu1  ;;  %v519_v41 = vmax.f32 %v513_v36, 0.0 }
 0x217   : > { %v520_v42 = vmax.f32 %v516_v39, 0.0 }
 0x219   : > { %v521_v43 = vpack.c.bf16 %v520_v42, %v519_v41 }
 0x21b   : > { %826 = vmatmul.mubr.bf16.vlgmr.msra.gmra.mrb[4].mxu0 %v521_v43 }
 0x2ee   : > { %v627_v45 = vpop.f32.mrb[4].mxu0 }
 0x2ef   : > { %v628_v46 = vadd.f32 %v742_v44, %v627_v45  ;;  %v827_v47 = vpop.f32.mrb[5].mxu0 }
 0x2f0   : > { %v630_v48 = vpop.f32.mrb[6].mxu0 }
 0x2f1   : > { %635 = vst.msk [vmem:[%s314_s20] sm:$0xff] %vm634_vm2, %v628_v46  ;;  %v631_v49 = vadd.f32 %v742_v44, %v630_v48  ;;  %v828_v50 = vpop.f32.mrb[7].mxu0 }
 0x2f3   : > { %636 = vst.msk [vmem:[%s314_s20 + $0x8] sm:$0xff] %vm634_vm2, %v631_v49 }
 0x2f4 PF: > { %p18_p6 = scmp.ge.s32.totalorder %s1098_s12, 4   ;;  %s1299_s24 = smov %s993_s25 }
 0x2f5   : > { %s1300_s25 = smov %s997_s26  ;;  %s1301_s26 = smov %s1124_s16 }
 0x2f6   : > { %s1302_s27 = smov %s1098_s12  ;;  %20 = sbr.rel (!%p18_p6) target bundleno = 4 (0x4), region = 92 }
 0x2fd   :  { %659 = vsyncpa [#allocation3], 1 }
 0x2fe   :  { %661 = vsyncpa [#allocation3 + $0x1], 1 }
 0x2ff   :  { %662 = vsyncpa [#allocation5], 1 }

</bundles_post_ra>
